<compile_context>
chip_gen: v7x
topology: tpu7x:2x2x1
jax: 0.10.0
libtpu: 0.0.40
codegen_flags: <defaults>
</compile_context>

<pallas_src>
import jax
import jax.numpy as jnp
from jax.experimental import pallas as pl
from jax.experimental.pallas import tpu as pltpu


def _bfd_kernel(xsT_ref, w1T_ref, bias_ref, w2T_ref, b2_ref, diag_ref,
                dxsT_ref, negdivT_ref):
    # All operands are VMEM tiles; batch lives on lanes (last dim).
    xT = xsT_ref[...]                                                  # [D, TB]
    # dynamics forward (transposed): z^T = W1^T @ x^T + (b1 + t*wt)
    zT = jnp.dot(w1T_ref[...], xT, preferred_element_type=jnp.float32)  # [H, TB]
    hT = jnp.tanh(zT + bias_ref[...])                                   # [H, TB]
    dxsT = jnp.dot(w2T_ref[...], hT,
                   preferred_element_type=jnp.float32) + b2_ref[...]    # [D, TB]
    dxsT_ref[...] = dxsT.astype(dxsT_ref.dtype)
    # exact divergence (trace of Jacobian) as a third MXU matmul sharing h:
    #   -div^T = - diag[1,H] @ (1 - h^2)[H,TB]
    one_minus_h2 = 1.0 - hT * hT                                         # [H, TB]
    negdivT = -jnp.dot(diag_ref[...], one_minus_h2,
                       preferred_element_type=jnp.float32)               # [1, TB]
    negdivT_ref[...] = negdivT.astype(negdivT_ref.dtype)


def brute_force_estimator_fast(t, xs, w1, b1, wt, w2, b2, *, tile_b=1024):
    """Returns (dxs [B, D], -divergence [B, 1]) exactly like the torch module
    (divergence returned in float32, see review note)."""
    B, D = xs.shape
    H = w1.shape[1]

    # ---- batch-on-lanes layout: pad batch to a multiple of 128 lanes ----
    Bp = pl.cdiv(B, 128) * 128
    tile_b = max(128, (min(tile_b, Bp) // 128) * 128)
    # prefer >= 2 grid steps so both TensorCores get work on megacore parts (v7x)
    if Bp // tile_b < 2 and Bp >= 256:
        tile_b = max(128, ((Bp // 2) // 128) * 128)
    Bp = pl.cdiv(Bp, tile_b) * tile_b

    xsT = jnp.pad(xs.T, ((0, 0), (0, Bp - B)))                       # [D, Bp]

    # ---- parameter glue (done once, outside the hot loop) ----
    w1T = w1.T                                                        # [H, D]
    w2T = w2.T                                                        # [D, H]
    # fold the (grid-constant) time-dependent bias: b1 + t*wt
    bias = (jnp.asarray(b1, jnp.float32)
            + jnp.asarray(t, jnp.float32) * jnp.asarray(wt, jnp.float32))[:, None]  # [H,1]
    b2c = jnp.asarray(b2, jnp.float32)[:, None]                       # [D, 1]
    # diag[k] = sum_i W1[i, k] * W2[k, i]
    diag = jnp.sum(w1.T * w2, axis=1)[None, :].astype(jnp.float32)    # [1, H]

    grid = (Bp // tile_b,)
    full = lambda shape: pl.BlockSpec(shape, lambda i: (0, 0))

    dxsT, negdivT = pl.pallas_call(
        _bfd_kernel,
        out_shape=(
            jax.ShapeDtypeStruct((D, Bp), xs.dtype),
            jax.ShapeDtypeStruct((1, Bp), jnp.float32),
        ),
        grid_spec=pltpu.PrefetchScalarGridSpec(
            num_scalar_prefetch=0,
            grid=grid,
            in_specs=[
                pl.BlockSpec((D, tile_b), lambda i: (0, i)),          # xs^T
                full((H, D)),                                         # W1^T
                full((H, 1)),                                         # b1 + t*wt
                full((D, H)),                                         # W2^T
                full((D, 1)),                                         # b2
                full((1, H)),                                         # diag
            ],
            out_specs=[
                pl.BlockSpec((D, tile_b), lambda i: (0, i)),          # dxs^T
                pl.BlockSpec((1, tile_b), lambda i: (0, i)),          # -divergence^T
            ],
        ),
        compiler_params=pltpu.CompilerParams(
            dimension_semantics=("parallel",),
            vmem_limit_bytes=32 * 1024 * 1024),
    )(xsT, w1T, bias, w2T, b2c, diag)

    dxs = dxsT[:, :B].T                                               # [B, D]
    neg_div = negdivT[0, :B][:, None]                                 # [B, 1] (f32)
    return dxs, neg_div


def _dynamics_ref(t, xs, w1, b1, wt, w2, b2):
    h = jnp.tanh(xs @ w1 + t * wt + b1)
    return h @ w2 + b2


if __name__ == "__main__":
    # batch=200 (exercises lane padding + 2 grid steps), system_dim=4, hidden=32
    B, D, H = 200, 4, 32
    key = jax.random.PRNGKey(0)
    k_x, k_w1, k_b1, k_wt, k_w2, k_b2 = jax.random.split(key, 6)

    xs = jax.random.normal(k_x, (B, D), dtype=jnp.float32)
    w1 = jax.random.normal(k_w1, (D, H), dtype=jnp.float32) * 0.3
    b1 = jax.random.normal(k_b1, (H,), dtype=jnp.float32) * 0.1
    wt = jax.random.normal(k_wt, (H,), dtype=jnp.float32) * 0.1
    w2 = jax.random.normal(k_w2, (H, D), dtype=jnp.float32) * 0.3
    b2 = jax.random.normal(k_b2, (D,), dtype=jnp.float32) * 0.1
    t = 0.5

    dxs, neg_div = brute_force_estimator_fast(t, xs, w1, b1, wt, w2, b2)
    jax.block_until_ready((dxs, neg_div))

    # Reference: same semantics as the torch module (autodiff trace of Jacobian).
    dxs_ref = _dynamics_ref(t, xs, w1, b1, wt, w2, b2)
    jac = jax.vmap(jax.jacfwd(
        lambda x: _dynamics_ref(t, x[None], w1, b1, wt, w2, b2)[0]))(xs)
    div_ref = jnp.trace(jac, axis1=-2, axis2=-1)
    neg_div_ref = -div_ref[:, None]

    assert dxs.shape == (B, D) and neg_div.shape == (B, 1)
    assert jnp.allclose(dxs, dxs_ref, atol=1e-5, rtol=1e-5)
    assert jnp.allclose(neg_div, neg_div_ref, atol=1e-5, rtol=1e-5)

    print("KERNEL_OK")
</pallas_src>

<mosaic_0001>
module attributes {stable_mosaic.version = 11 : i64} {
  func.func @_bfd_kernel(%arg0: i32, %arg1: memref<4x128xf32, #tpu.memory_space<vmem>>, %arg2: memref<32x4xf32, #tpu.memory_space<vmem>>, %arg3: memref<32x1xf32, #tpu.memory_space<vmem>>, %arg4: memref<4x32xf32, #tpu.memory_space<vmem>>, %arg5: memref<4x1xf32, #tpu.memory_space<vmem>>, %arg6: memref<1x32xf32, #tpu.memory_space<vmem>>, %arg7: memref<4x128xf32, #tpu.memory_space<vmem>>, %arg8: memref<1x128xf32, #tpu.memory_space<vmem>>) attributes {dimension_semantics = [#tpu.dimension_semantics<parallel>], iteration_bounds = array<i64: 2>, scalar_prefetch = 0 : i64, scratch_operands = 0 : i64, tpu.core_type = #tpu.core_type<tc>, window_params = [{transform_indices = @transform_0, window_bounds = array<i64: 4, 128>}, {pipeline_mode = #tpu.pipeline_mode<synchronous>, transform_indices = @transform_1, window_bounds = array<i64: 32, 4>}, {pipeline_mode = #tpu.pipeline_mode<synchronous>, transform_indices = @transform_2, window_bounds = array<i64: 32, 1>}, {pipeline_mode = #tpu.pipeline_mode<synchronous>, transform_indices = @transform_3, window_bounds = array<i64: 4, 32>}, {pipeline_mode = #tpu.pipeline_mode<synchronous>, transform_indices = @transform_4, window_bounds = array<i64: 4, 1>}, {pipeline_mode = #tpu.pipeline_mode<synchronous>, transform_indices = @transform_5, window_bounds = array<i64: 1, 32>}, {transform_indices = @transform_6, window_bounds = array<i64: 4, 128>}, {transform_indices = @transform_7, window_bounds = array<i64: 1, 128>}]} {
    %c0 = arith.constant 0 : index
    %c0_0 = arith.constant 0 : index
    %0 = vector.load %arg1[%c0, %c0_0] : memref<4x128xf32, #tpu.memory_space<vmem>>, vector<4x128xf32>
    %c0_1 = arith.constant 0 : index
    %c0_2 = arith.constant 0 : index
    %1 = vector.load %arg2[%c0_1, %c0_2] : memref<32x4xf32, #tpu.memory_space<vmem>>, vector<32x4xf32>
    %cst = arith.constant dense<0.000000e+00> : vector<32x128xf32>
    %2 = tpu.matmul %1, %0, %cst {dimension_numbers = #tpu.dot_dimension_numbers<[1], [0], [0], [1], [0, 0, 1, 1], [], []>} : vector<32x4xf32>, vector<4x128xf32>, vector<32x128xf32> -> vector<32x128xf32>
    %c0_3 = arith.constant 0 : index
    %c0_4 = arith.constant 0 : index
    %3 = vector.load %arg3[%c0_3, %c0_4] : memref<32x1xf32, #tpu.memory_space<vmem>>, vector<32x1xf32>
    %4 = vector.broadcast %3 : vector<32x1xf32> to vector<32x128xf32>
    %5 = arith.addf %2, %4 : vector<32x128xf32>
    %6 = math.tanh %5 : vector<32x128xf32>
    %c0_5 = arith.constant 0 : index
    %c0_6 = arith.constant 0 : index
    %7 = vector.load %arg4[%c0_5, %c0_6] : memref<4x32xf32, #tpu.memory_space<vmem>>, vector<4x32xf32>
    %cst_7 = arith.constant dense<0.000000e+00> : vector<4x128xf32>
    %8 = tpu.matmul %7, %6, %cst_7 {dimension_numbers = #tpu.dot_dimension_numbers<[1], [0], [0], [1], [0, 0, 1, 1], [], []>} : vector<4x32xf32>, vector<32x128xf32>, vector<4x128xf32> -> vector<4x128xf32>
    %c0_8 = arith.constant 0 : index
    %c0_9 = arith.constant 0 : index
    %9 = vector.load %arg5[%c0_8, %c0_9] : memref<4x1xf32, #tpu.memory_space<vmem>>, vector<4x1xf32>
    %10 = vector.broadcast %9 : vector<4x1xf32> to vector<4x128xf32>
    %11 = arith.addf %8, %10 : vector<4x128xf32>
    %c0_10 = arith.constant 0 : index
    %c0_11 = arith.constant 0 : index
    %12 = vector.load %arg7[%c0_10, %c0_11] : memref<4x128xf32, #tpu.memory_space<vmem>>, vector<4x128xf32>
    tpu.vector_store %arg7[%c0_10, %c0_11], %11 {strides = array<i32>} : memref<4x128xf32, #tpu.memory_space<vmem>>, vector<4x128xf32>,
    %13 = arith.mulf %6, %6 : vector<32x128xf32>
    %cst_12 = arith.constant 1.000000e+00 : f32
    %14 = vector.broadcast %cst_12 : f32 to vector<32x128xf32>
    %15 = arith.subf %14, %13 : vector<32x128xf32>
    %c0_13 = arith.constant 0 : index
    %c0_14 = arith.constant 0 : index
    %16 = vector.load %arg6[%c0_13, %c0_14] : memref<1x32xf32, #tpu.memory_space<vmem>>, vector<1x32xf32>
    %cst_15 = arith.constant dense<0.000000e+00> : vector<1x128xf32>
    %17 = tpu.matmul %16, %15, %cst_15 {dimension_numbers = #tpu.dot_dimension_numbers<[1], [0], [0], [1], [0, 0, 1, 1], [], []>} : vector<1x32xf32>, vector<32x128xf32>, vector<1x128xf32> -> vector<1x128xf32>
    %cst_16 = arith.constant 0.000000e+00 : f32
    %18 = vector.broadcast %cst_16 : f32 to vector<1x128xf32>
    %19 = arith.subf %18, %17 : vector<1x128xf32>
    %c0_17 = arith.constant 0 : index
    %c0_18 = arith.constant 0 : index
    %20 = vector.load %arg8[%c0_17, %c0_18] : memref<1x128xf32, #tpu.memory_space<vmem>>, vector<1x128xf32>
    tpu.vector_store %arg8[%c0_17, %c0_18], %19 {strides = array<i32>} : memref<1x128xf32, #tpu.memory_space<vmem>>, vector<1x128xf32>,
    return
  }
  func.func @transform_0(%arg0: i32) -> (i32, i32) {
    %c0_i32 = arith.constant 0 : i32
    %c0_i32_0 = arith.constant 0 : i32
    return %c0_i32, %arg0 : i32, i32
  }
  func.func @transform_1(%arg0: i32) -> (i32, i32) {
    %c0_i32 = arith.constant 0 : i32
    %c0_i32_0 = arith.constant 0 : i32
    %c0_i32_1 = arith.constant 0 : i32
    return %c0_i32, %c0_i32_0 : i32, i32
  }
  func.func @transform_2(%arg0: i32) -> (i32, i32) {
    %c0_i32 = arith.constant 0 : i32
    %c0_i32_0 = arith.constant 0 : i32
    %c0_i32_1 = arith.constant 0 : i32
    return %c0_i32, %c0_i32_0 : i32, i32
  }
  func.func @transform_3(%arg0: i32) -> (i32, i32) {
    %c0_i32 = arith.constant 0 : i32
    %c0_i32_0 = arith.constant 0 : i32
    %c0_i32_1 = arith.constant 0 : i32
    return %c0_i32, %c0_i32_0 : i32, i32
  }
  func.func @transform_4(%arg0: i32) -> (i32, i32) {
    %c0_i32 = arith.constant 0 : i32
    %c0_i32_0 = arith.constant 0 : i32
    %c0_i32_1 = arith.constant 0 : i32
    return %c0_i32, %c0_i32_0 : i32, i32
  }
  func.func @transform_5(%arg0: i32) -> (i32, i32) {
    %c0_i32 = arith.constant 0 : i32
    %c0_i32_0 = arith.constant 0 : i32
    %c0_i32_1 = arith.constant 0 : i32
    return %c0_i32, %c0_i32_0 : i32, i32
  }
  func.func @transform_6(%arg0: i32) -> (i32, i32) {
    %c0_i32 = arith.constant 0 : i32
    %c0_i32_0 = arith.constant 0 : i32
    return %c0_i32, %arg0 : i32, i32
  }
  func.func @transform_7(%arg0: i32) -> (i32, i32) {
    %c0_i32 = arith.constant 0 : i32
    %c0_i32_0 = arith.constant 0 : i32
    return %c0_i32, %arg0 : i32, i32
  }
}

</mosaic_0001>

<bundles_post_ra>
// kernel: tpu_custom_call.1
= control target key start
LH: loop header
LB: loop body
LE: loop exit
PB: predicated region body
PF: predicated region fallthrough
CT: control target
= control target key end

     0   :  { %13 = vsyncpa [#allocation3], 0  ;;  %s1159_s0 = inlined_call_operand.vmem [shape: f32[4,256], index: 0, kind: input, shape index: {}]   ;;  %s1160_s1 = inlined_call_operand.vmem [shape: f32[32,4], index: 1, kind: input, shape index: {}]   ;;  %s1161_s2 = inlined_call_operand.vmem [shape: f32[32,1], index: 2, kind: input, shape index: {}]   ;;  %s1162_s3 = inlined_call_operand.vmem [shape: f32[4,32], index: 3, kind: input, shape index: {}]   ;;  %s1163_s4 = inlined_call_operand.vmem [shape: f32[4,1], index: 4, kind: input, shape index: {}]   ;;  %s1164_s5 = inlined_call_operand.vmem [shape: f32[1,32], index: 5, kind: input, shape index: {}]   ;;  %s1165_s6 = inlined_call_operand.hbm [shape: f32[4,256], index: 6, kind: output, shape index: {0}]   ;;  %s1166_s7 = inlined_call_operand.hbm [shape: f32[1,256], index: 7, kind: output, shape index: {1}]  }
   0x1   :  { %15 = vsyncpa [#allocation3 + $0x1], 0 }
   0x2   :  { %16 = vsyncpa [#allocation5], 0 }
   0x3   :  { %18 = vsyncpa [#allocation5 + $0x1], 0  ;;  %s978_s24 = smov 0   ;;  %s980_s25 = smov 0  }
   0x4   :  { %s982_s26 = smov 0   ;;  %s984_s27 = smov 0  }
   0x5 LB: > { %s999_s28 = sadd.s32 4294967295, %s930_s27   ;;  %s703_s29 = sadd.s32 4294967294, %s930_s27   ;;  %s930_s27 = sphi %s984_s27, %s1174_s27   ;;  %s926_s26 = sphi %s982_s26, %s1173_s26   ;;  %s922_s25 = sphi %s980_s25, %s1172_s25   ;;  %s918_s24 = sphi %s978_s24, %s1171_s24  }
   0x6   : > { %s1003_s30 = sadd.s32 1, %s930_s27   ;;  %s162_s8 = sadd.s32 1, %s926_s26 }
   0x7   : > { %s159_s9 = ssub.s32 %s930_s27, %s1003_s30  ;;  %p172_p0 = scmp.ne.s32.totalorder %s926_s26, %s922_s25 }
   0x8   : > { %p160_p1 = scmp.eq.s32.totalorder %s159_s9, 0  ;;  %p173_p2 = scmp.eq.s32.totalorder %s999_s28, 1 }
   0x9   : > { %p178_p3 = scmp.ne.s32.totalorder %s922_s25, %s918_s24  ;;  %p179_p4 = scmp.eq.s32.totalorder %s703_s29, 1 }
   0xa   : > { %s1014_s10 = scalar_select %p160_p1, %s926_s26, %s162_s8  }
   0xb   : > { %p1016_p5 = por %p173_p2, %p172_p0  ;;  %p1020_p6 = por %p179_p4, %p178_p3 }
   0xc   : > { %p706_p7 = scmp.ge.s32.totalorder %s930_s27, 1  ;;  %p245_p8 = scmp.lt.s32.totalorder %s930_s27, 3 }
   0xe   : > { %p246_p9 = pnand %p706_p7, %p245_p8 }
   0xf   : > { %p280_p10 = scmp.lt.s32.totalorder (!%p246_p9), %s999_s28, 1  ;;  %v285_v0 = vld [vmem:[%s1160_s1] sm:$0xff] (!%p246_p9)  ;;  %vm313_vm0 = vcmask (!%p246_p9), 31744   ;;  %v932_v2 = vmov (!%p246_p9), 0   ;;  %v291_v3 = vld [vmem:[%s1161_s2 + $0x10] sm:$0xff] (!%p246_p9)  ;;  %vm326_vm1 = vcmask (!%p246_p9), 1043456  }
  0x10   : > { %249 = sbr.rel (%p246_p9) target bundleno = 518 (0x206), region = 44  ;;  %738 = vmatprep.mubr.msk.f32.mxu0 (!%p246_p9), %vm313_vm0, %v285_v0  ;;  %v289_v1 = vld [vmem:[%s1161_s2] sm:$0xff] (!%p246_p9)  ;;  %826 = vset.pattern.permute.xlu0 (!%p246_p9), %v932_v2  ;;  %v290_v4 = vld [vmem:[%s1161_s2 + $0x8] sm:$0xff] (!%p246_p9)  ;;  %v292_v5 = vld [vmem:[%s1161_s2 + $0x18] sm:$0xff] (!%p246_p9)  ;;  %v933_v11 = vmov (!%p246_p9), 0.0|0.0   ;;  %vm934_vm2 = vmmov (!%p246_p9), 0  }
  0x11   : > { %827 = vset.pattern.permute.xlu1 (!%p246_p9), %v932_v2  ;;  %295 = vperm.xlu0 (!%p246_p9), %826, %v289_v1   ;;  %v286_v7 = vld [vmem:[%s1160_s1 + $0x8] sm:$0xff] (!%p246_p9)  ;;  %v287_v8 = vld [vmem:[%s1160_s1 + $0x10] sm:$0xff] (!%p246_p9)  ;;  %v420_v9 = vld [vmem:[%s1163_s4] sm:$0xf] (!%p246_p9)  ;;  %v935_v12 = vmov (!%p246_p9), 0.0   ;;  %vm426_vm3 = vcmask (!%p246_p9), 261120  }
  0x12   : > { %305 = vperm.xlu1 (!%p246_p9), %827, %v291_v3   ;;  %v288_v10 = vld [vmem:[%s1160_s1 + $0x18] sm:$0xff] (!%p246_p9)  ;;  %766 = vmatprep.subr.bf16.mxu1 (!%p246_p9), %v933_v11  ;;  %v419_v39 = vld [vmem:[%s1162_s3] sm:$0xf] (!%p246_p9)  ;;  %s1069_s9 = sand.u32 (!%p246_p9), 1, %s922_s25   ;;  %s717_s14 = sshll.u32 (!%p246_p9), %s999_s28, 6 }
  0x13   : > { %752 = vmatprep.mubr.msk.f32.mxu1 (!%p246_p9), %vm934_vm2, %v935_v12  ;;  %v509_v42 = vld [vmem:[%s1164_s5] sm:$0x1] (!%p246_p9)  ;;  %s707_s13 = sshll.u32 (!%p246_p9), %s1069_s9, 2  ;;  %s1076_s19 = scalar_lea.hbm (!%p246_p9), %s1165_s6, %s717_s14 }
  0x14   : > { %s273_s15 = scalar_lea.vmem (!%p246_p9), [#allocation2], %s707_s13  ;;  %s1167_s21 = scalar_lea.vmem (!%p246_p9), [#allocation4], %s1069_s9 }
  0x15   : > { %300 = vperm.xlu0 (!%p246_p9), %826, %v290_v4   ;;  %s603_s16 = sshll.u32 (!%p246_p9), %s273_s15, 4  ;;  %s1084_s22 = sshll.u32 (!%p246_p9), %s1167_s21, 4  ;;  %s1078_s16 = int_to_ptr.vmem [resolvable:$true] %s603_s16  ;;  %s1116_s22 = int_to_ptr.vmem [resolvable:$true] %s1084_s22 }
  0x16   : > { %310 = vperm.xlu1 (!%p246_p9), %827, %v292_v5   ;;  %s586_s23 = scalar_lea.sflag (!%p246_p9), [#allocation3], %s1069_s9  ;;  %s836_s29 = scalar_lea.vmem (!%p246_p9), %s1078_s16, 64 }
  0x17   : > { %s281_s17 = scalar_select %p280_p10, %s999_s28, 1 }
  0x18   : > { %p837_p11 = scmp.ne.s32.totalorder %s1078_s16, %s836_s29 }
  0x19   : > { %s708_s20 = sshll.u32 %s281_s17, 2  ;;  %423 = vperm.xlu0 %826, %v420_v9  }
  0x1a   : > { %s283_s8 = scalar_lea.vmem %s1159_s0, %s708_s20  ;;  %s718_s20 = sshll.u32 %s999_s28, 4 }
  0x1b   : > { %v284_v6 = vld [vmem:[%s283_s8] sm:$0xf]  ;;  %p838_p12 = pnand %p837_p11, %p1016_p5  ;;  %s936_s8 = smov [#allocation2]  }
  0x1c   : > { %736 = vmatprep.subr.msk.mxu0 %vm326_vm1, %v284_v6  ;;  %s840_s13 = sshll.u32 %s936_s8, 4  ;;  %s841_s13 = int_to_ptr.vmem [resolvable:$false] %s840_s13 }
  0x1d   : > { %737 = vmatpush3.msk.msra.mxu0 %vm326_vm1, %v284_v6  ;;  %p839_p13 = pneg %p838_p12  ;;  %s842_s14 = scalar_lea.vmem %s841_s13, 128 }
  0x1e   : > { %739 = vmatmul.mubr.msk.f32.vlgmr.msra.gmra.mrb[0].mxu0 %vm313_vm0, %v286_v7  ;;  %772 = vmatprep.subr.bf16.mxu0 %v933_v11  ;;  %p843_p0 = scmp.lt.s32.totalorder %s1078_s16, %s841_s13  ;;  %p844_p1 = scmp.lt.s32.totalorder %s842_s14, %s836_s29 }
  0x1f   : > { %741 = vmatprep.mubr.msk.f32.mxu0 %vm313_vm0, %v287_v8 }
  0x20   : > { %p845_p2 = por %p844_p1, %p843_p0 }
  0x22   : > { %742 = vmatmul.mubr.msk.f32.gmra.mrb[2].mxu0 %vm313_vm0, %v288_v10  ;;  %p846_p3 = pnand %p845_p2, %p839_p13 }
  0x23   : > { %763 = vmatprep.mubr.msk.f32.mxu0 %vm934_vm2, %v935_v12 }
  0x90   : > { %v296_v13 = vpop.permute.xlu0 %295 }
  0x91   : > { %v306_v14 = vpop.permute.xlu1 %305 }
  0x94   : > { %v301_v15 = vpop.permute.xlu0 %300 }
  0x95   : > { %v311_v20 = vpop.permute.xlu1 %310 }
  0x98   : > { %v424_v43 = vpop.permute.xlu0 %423 }
  0xf1   : > { %v740_v16 = vpop.f32.mrb[0].mxu0 }
  0xf2   : > { %v402_v17 = vadd.f32 %v740_v16, %v301_v15  ;;  %v396_v18 = vpop.f32.mrb[1].mxu0 }
  0xf3   : > { %v397_v19 = vadd.f32 %v396_v18, %v296_v13 }
  0xf4   : > { %828 = vtanh.f32 %v402_v17 }
  0xf5   : > { %830 = vtanh.f32 %v397_v19  ;;  %v743_v21 = vpop.f32.mrb[2].mxu0 }
  0xf6   : > { %v412_v22 = vadd.f32 %v743_v21, %v311_v20  ;;  %v406_v23 = vpop.f32.mrb[3].mxu0 }
  0xf7   : > { %v407_v24 = vadd.f32 %v406_v23, %v306_v14 }
  0xf8   : > { %832 = vtanh.f32 %v412_v22 }
  0xf9   : > { %834 = vtanh.f32 %v407_v24 }
  0xfe   : > { %v829_v25 = vpop.eup %828 }
  0xff   : > { %v831_v26 = vpop.eup %830  ;;  %v502_v27 = vmul.f32 %v829_v25, %v829_v25 }
 0x100   : > { %v767_v28 = vpack.c.bf16 %v829_v25, %v831_v26  ;;  %v501_v29 = vmul.f32 %v831_v26, %v831_v26 }
 0x101   : > { %v506_v30 = vsub.f32 1.0, %v502_v27 }
 0x102   : > { %v833_v31 = vpop.eup %832  ;;  %768 = vmatpush3.bf16.msra.mxu1 %v767_v28  ;;  %v505_v32 = vsub.f32 1.0, %v501_v29 }
 0x103   : > { %v835_v33 = vpop.eup %834  ;;  %769 = vmatprep.subr.bf16.mxu1 %v933_v11  ;;  %v504_v34 = vmul.f32 %v833_v31, %v833_v31 }
 0x104   : > { %v770_v35 = vpack.c.bf16 %v833_v31, %v835_v33  ;;  %v773_v36 = vpack.c.bf16 %v506_v30, %v505_v32  ;;  %v503_v37 = vmul.f32 %v835_v33, %v835_v33 }
 0x105   : > { %v508_v38 = vsub.f32 1.0, %v504_v34 }
 0x106   : > { %771 = vmatpush3.bf16.msra.mxu1 %v770_v35  ;;  %774 = vmatpush3.bf16.msra.mxu0 %v773_v36  ;;  %v507_v40 = vsub.f32 1.0, %v503_v37 }
 0x107   : > { %775 = vmatprep.subr.bf16.mxu0 %v933_v11 }
 0x108   : > { %v776_v41 = vpack.c.bf16 %v508_v38, %v507_v40 }
 0x109   : > { %753 = vmatmul.mubr.msk.f32.vlgmr.msra.gmra.mrb[0].mxu1 %vm426_vm3, %v419_v39 }
 0x10a   : > { %777 = vmatpush3.bf16.msra.mxu0 %v776_v41 }
 0x10d   : > { %764 = vmatmul.mubr.msk.f32.vlgmr.msra.gmra.mrb[4].mxu0 %vm426_vm3, %v509_v42 }
 0x1dc   : > { %v496_v44 = vpop.f32.mrb[0].mxu1 }
 0x1dd   : > { %v497_v45 = vadd.f32 %v496_v44, %v424_v43  ;;  %v754_v46 = vpop.f32.mrb[1].mxu1 }
 0x1df   : > { %500 = vst [vmem:[%s273_s15] sm:$0xf] %v497_v45 }
 0x1e0   : > { %v579_v47 = vpop.f32.mrb[4].mxu0 }
 0x1e1   : > { %849 = shalt.err (!%p846_p3)
}
 0x1e2   : > { %s850_s15 = scalar_lea.hbm %s1076_s19, 64  ;;  %s854_s8 = scalar_lea.hbm %s1165_s6, 128 }
 0x1e3   : > { %p851_p4 = scmp.ne.s32.totalorder %s1076_s19, %s850_s15  ;;  %p855_p9 = scmp.lt.u32.totalorder %s1076_s19, %s1165_s6 }
 0x1e4   : > { %p856_p10 = scmp.lt.u32.totalorder %s854_s8, %s850_s15  ;;  %p858_p12 = scmp.lt.u32.totalorder %s850_s15, %s1076_s19 }
 0x1e5   : > { %p852_p7 = pnand %p851_p4, %p1016_p5 }
 0x1e6   : > { %p857_p11 = por %p856_p10, %p855_p9 }
 0x1e7   : > { %p853_p8 = pneg %p852_p7 }
 0x1e8   : > { %p859_p13 = por %p858_p12, %p857_p11 }
 0x1ea   : > { %p860_p0 = pnand %p859_p13, %p853_p8 }
 0x1ec   : > { %863 = shalt.err (!%p860_p0)
}
 0x1ed   : > { %778 = dma.vmem_to_hbm [thread:$0]  (%p1016_p5), %s1078_s16, 64, %s1076_s19, %s586_s23   ;;  %v583_v48 = vsub.f32 0.0, %v579_v47  ;;  %v765_v49 = vpop.f32.mrb[5].mxu0 }
 0x1ee   : > { %s1113_s14 = scalar_lea.hbm %s1166_s7, %s718_s20  ;;  %s1170_s15 = scalar_lea.vmem [#allocation4], %s1069_s9 }
 0x1ef   : > { %584 = vst [vmem:[%s1170_s15] sm:$0x1] %v583_v48  ;;  %s591_s17 = scalar_lea.sflag [#allocation5], %s1069_s9  ;;  %s864_s18 = scalar_lea.vmem %s1116_s22, 16 }
 0x1f0   : > { %p865_p1 = scmp.ne.s32.totalorder %s1116_s22, %s864_s18  ;;  %s937_s16 = smov [#allocation4]  }
 0x1f1   : > { %s868_s28 = sshll.u32 %s937_s16, 4  ;;  %s869_s28 = int_to_ptr.vmem [resolvable:$false] %s868_s28 }
 0x1f2   : > { %p866_p2 = pnand %p865_p1, %p1016_p5  ;;  %s870_s19 = scalar_lea.vmem %s869_s28, 32 }
 0x1f3   : > { %p871_p4 = scmp.lt.s32.totalorder %s1116_s22, %s869_s28  ;;  %p872_p7 = scmp.lt.s32.totalorder %s870_s19, %s864_s18 }
 0x1f4   : > { %p867_p3 = pneg %p866_p2 }
 0x1f5   : > { %p873_p8 = por %p872_p7, %p871_p4 }
 0x1f7   : > { %p874_p9 = pnand %p873_p8, %p867_p3 }
 0x1f9   : > { %877 = shalt.err (!%p874_p9)
}
 0x1fa   : > { %s878_s9 = scalar_lea.hbm %s1113_s14, 16  ;;  %s882_s8 = scalar_lea.hbm %s1166_s7, 32 }
 0x1fb   : > { %p879_p10 = scmp.ne.s32.totalorder %s1113_s14, %s878_s9  ;;  %p883_p13 = scmp.lt.u32.totalorder %s1113_s14, %s1166_s7 }
 0x1fc   : > { %p884_p0 = scmp.lt.u32.totalorder %s882_s8, %s878_s9  ;;  %p886_p2 = scmp.lt.u32.totalorder %s878_s9, %s1113_s14 }
 0x1fd   : > { %p880_p11 = pnand %p879_p10, %p1016_p5 }
 0x1fe   : > { %p885_p1 = por %p884_p0, %p883_p13 }
 0x1ff   : > { %p881_p12 = pneg %p880_p11 }
 0x200   : > { %p887_p3 = por %p886_p2, %p885_p1 }
 0x202   : > { %p888_p4 = pnand %p887_p3, %p881_p12 }
 0x204   : > { %891 = shalt.err (!%p888_p4)
}
 0x205   : > { %779 = dma.vmem_to_hbm [thread:$0]  (%p1016_p5), %s1116_s22, 16, %s1113_s14, %s591_s17  }
 0x206 PF: > { %p789_p7 = scmp.ge.s32.totalorder %s930_s27, 2  ;;  %s628_s29 = sand.u32 1, %s918_s24  }
 0x207   : > { %s629_s15 = scalar_lea.sflag [#allocation3], %s628_s29 }
 0x208   : > { %p783_p8 = pnand %p789_p7, %p1020_p6 }
 0x20a   : > { %909 = dma.done.wait (!%p783_p8), %s629_s15, 64  }
 0x20b   : > { %911 = vsyncadd (!%p783_p8), %s629_s15, 4294967232  ;;  %s638_s18 = scalar_lea.sflag [#allocation5], %s628_s29 }
 0x20c   : > { %913 = dma.done.wait (!%p783_p8), %s638_s18, 16  }
 0x20d   : > { %915 = vsyncadd (!%p783_p8), %s638_s18, 4294967280  ;;  %p21_p5 = scmp.ge.s32.totalorder %s1003_s30, 4   ;;  %s1171_s24 = smov %s922_s25 }
 0x20e   : > { %s1172_s25 = smov %s926_s26  ;;  %s1173_s26 = smov %s1014_s10 }
 0x20f   : > { %s1174_s27 = smov %s1003_s30  ;;  %23 = sbr.rel (!%p21_p5) target bundleno = 5 (0x5), region = 96 }
 0x216   :  { %642 = vsyncpa [#allocation3], 1 }
 0x217   :  { %644 = vsyncpa [#allocation3 + $0x1], 1 }
 0x218   :  { %645 = vsyncpa [#allocation5], 1 }
 0x219   :  { %647 = vsyncpa [#allocation5 + $0x1], 1 }

</bundles_post_ra>
